<compile_context>
chip_gen: v5e
topology: v5e:2x2
jax: 0.10.0
libtpu: 0.0.40
codegen_flags: <defaults>
</compile_context>

<pallas_src>
import math
import functools

import jax
import jax.numpy as jnp
from jax.experimental import pallas as pl
from jax.experimental.pallas import tpu as pltpu


def _dist_params(out):
    """out: (TB, P) pre-activation. Column P-1 -> softplus(.)+1e-3 (scale),
    other columns pass through (loc). Done lane-wise: no width-1 slices."""
    P = out.shape[-1]
    col = jax.lax.broadcasted_iota(jnp.int32, out.shape, 1)
    transformed = jax.nn.softplus(out) + 0.001
    return jnp.where(col == (P - 1), transformed, out)


def _mlp_scale_params_kernel(x_ref, w1_ref, b1_ref, w2_ref, b2_ref, params_ref):
    # Hidden layer: MXU matmul (f32 accumulate) + VPU relu. Hidden stays in VMEM.
    x = x_ref[...]
    h = jnp.dot(x, w1_ref[...], preferred_element_type=jnp.float32) + b1_ref[...]
    h = jnp.maximum(h, 0.0)
    # Final projection to distribution parameters, single lane-packed store.
    out = jnp.dot(h.astype(w2_ref.dtype), w2_ref[...],
                  preferred_element_type=jnp.float32) + b2_ref[...]
    params_ref[...] = _dist_params(out).astype(params_ref.dtype)


def _mlp_scale_hidden_kernel(x_ref, w1_ref, b1_ref, w2_ref, b2_ref,
                             h_ref, params_ref):
    # Optional debug path: also writes the hidden activation back to HBM.
    x = x_ref[...]
    h = jnp.dot(x, w1_ref[...], preferred_element_type=jnp.float32) + b1_ref[...]
    h = jnp.maximum(h, 0.0)
    h_ref[...] = h.astype(h_ref.dtype)
    out = jnp.dot(h.astype(w2_ref.dtype), w2_ref[...],
                  preferred_element_type=jnp.float32) + b2_ref[...]
    params_ref[...] = _dist_params(out).astype(params_ref.dtype)


def _round_up(n, m):
    return ((n + m - 1) // m) * m


_TB_MAX = 512  # batch-tile rows; sized for the v7x 64 MiB VMEM budget (tiny here anyway)


@functools.partial(jax.jit, static_argnames=("return_hidden",))
def mlp_scale_forward(x, w1, b1, w2, b2, *, return_hidden=False):
    """Returns (loc, scale) parametrizing the FoldedNormal; if return_hidden=True,
    returns (h, loc, scale) where h == MLPScale.network(x)."""
    B, D_in = x.shape
    H = w1.shape[1]
    P = w2.shape[1]  # == 2 (loc, scale)

    # Pick a batch tile: whole (8-padded) batch if small, else 512-row tiles.
    B8 = _round_up(B, 8)
    TB = B8 if B8 <= _TB_MAX else _TB_MAX
    B_pad = _round_up(B, TB)
    x_p = jnp.pad(x, ((0, B_pad - B), (0, 0))) if B_pad != B else x

    grid = (pl.cdiv(B_pad, TB),)

    x_spec = pl.BlockSpec((TB, D_in), lambda i: (i, 0))
    w1_spec = pl.BlockSpec((D_in, H), lambda i: (0, 0))   # VMEM-resident across steps
    b1_spec = pl.BlockSpec((1, H), lambda i: (0, 0))
    w2_spec = pl.BlockSpec((H, P), lambda i: (0, 0))
    b2_spec = pl.BlockSpec((1, P), lambda i: (0, 0))
    params_spec = pl.BlockSpec((TB, P), lambda i: (i, 0))

    cparams = pltpu.CompilerParams(dimension_semantics=("parallel",))

    if return_hidden:
        h_spec = pl.BlockSpec((TB, H), lambda i: (i, 0))
        h, params = pl.pallas_call(
            _mlp_scale_hidden_kernel,
            out_shape=(
                jax.ShapeDtypeStruct((B_pad, H), jnp.float32),
                jax.ShapeDtypeStruct((B_pad, P), jnp.float32),
            ),
            grid=grid,
            in_specs=[x_spec, w1_spec, b1_spec, w2_spec, b2_spec],
            out_specs=(h_spec, params_spec),
            compiler_params=cparams,
        )(x_p, w1, b1, w2, b2)
        params = params[:B]
        return h[:B], params[:, 0], params[:, 1]

    params = pl.pallas_call(
        _mlp_scale_params_kernel,
        out_shape=jax.ShapeDtypeStruct((B_pad, P), jnp.float32),
        grid=grid,
        in_specs=[x_spec, w1_spec, b1_spec, w2_spec, b2_spec],
        out_specs=params_spec,
        compiler_params=cparams,
    )(x_p, w1, b1, w2, b2)
    params = params[:B]
    return params[:, 0], params[:, 1]


def init_params(key, input_dimension=64, hidden_dimension=64,
                len_params=2, initial_scale_guess=2.0 / 140.0):
    """Deterministic init mirroring nn.Linear default (U(-1/sqrt(fan_in), 1/sqrt(fan_in)))
    plus MLPScale's custom final-layer bias. Weights stored (in, out) so kernel does x @ W."""
    k1, k2, k3 = jax.random.split(key, 3)
    bound1 = 1.0 / math.sqrt(input_dimension)
    w1 = jax.random.uniform(k1, (input_dimension, hidden_dimension),
                            jnp.float32, -bound1, bound1)
    b1 = jax.random.uniform(k2, (1, hidden_dimension), jnp.float32, -bound1, bound1)

    bound2 = 1.0 / math.sqrt(hidden_dimension)
    w2 = jax.random.uniform(k3, (hidden_dimension, len_params),
                            jnp.float32, -bound2, bound2)
    b2 = jnp.concatenate([
        jnp.full((1, len_params - 1), 0.1, jnp.float32),
        jnp.full((1, 1), math.log(initial_scale_guess), jnp.float32),
    ], axis=-1)
    return w1, b1, w2, b2


def _reference(x, w1, b1, w2, b2):
    h = jnp.maximum(x @ w1 + b1, 0.0)
    out = h @ w2 + b2
    return h, out[:, 0], jax.nn.softplus(out[:, 1]) + 0.001


if __name__ == "__main__":
    key = jax.random.PRNGKey(0)
    k_x, k_x2, k_p = jax.random.split(key, 3)

    D_in, H = 64, 64
    w1, b1, w2, b2 = init_params(k_p, input_dimension=D_in, hidden_dimension=H)

    # --- small batch, hidden returned (single-tile grid) ---
    # TODO(synk): at this toy size, fusing into the caller / plain XLA is faster than
    # a pallas_call; the tiled path below is what pays off at large B.
    B1 = 8
    x1 = jax.random.normal(k_x, (B1, D_in), jnp.float32)
    h, loc, scale = mlp_scale_forward(x1, w1, b1, w2, b2, return_hidden=True)
    jax.block_until_ready((h, loc, scale))
    h_r, loc_r, scale_r = _reference(x1, w1, b1, w2, b2)
    assert jnp.allclose(h, h_r, atol=1e-5)
    assert jnp.allclose(loc, loc_r, atol=1e-5)
    assert jnp.allclose(scale, scale_r, atol=1e-5)

    # --- larger batch, fast path (multi-tile pipelined grid + padding, no h writeback) ---
    B2 = 600  # > TB_MAX -> two 512-row tiles with padding sliced off
    x2 = jax.random.normal(k_x2, (B2, D_in), jnp.float32)
    loc2, scale2 = mlp_scale_forward(x2, w1, b1, w2, b2)
    jax.block_until_ready((loc2, scale2))
    _, loc2_r, scale2_r = _reference(x2, w1, b1, w2, b2)
    assert loc2.shape == (B2,) and scale2.shape == (B2,)
    assert jnp.allclose(loc2, loc2_r, atol=1e-5)
    assert jnp.allclose(scale2, scale2_r, atol=1e-5)

    print("KERNEL_OK")
</pallas_src>

<mosaic_0001>
module attributes {stable_mosaic.version = 11 : i64} {
  func.func @_mlp_scale_hidden_kernel(%arg0: i32, %arg1: memref<8x64xf32, #tpu.memory_space<vmem>>, %arg2: memref<64x64xf32, #tpu.memory_space<vmem>>, %arg3: memref<1x64xf32, #tpu.memory_space<vmem>>, %arg4: memref<64x2xf32, #tpu.memory_space<vmem>>, %arg5: memref<1x2xf32, #tpu.memory_space<vmem>>, %arg6: memref<8x64xf32, #tpu.memory_space<vmem>>, %arg7: memref<8x2xf32, #tpu.memory_space<vmem>>) attributes {dimension_semantics = [#tpu.dimension_semantics<parallel>], iteration_bounds = array<i64: 1>, scalar_prefetch = 0 : i64, scratch_operands = 0 : i64, tpu.core_type = #tpu.core_type<tc>, window_params = [{transform_indices = @transform_0, window_bounds = array<i64: 8, 64>}, {pipeline_mode = #tpu.pipeline_mode<synchronous>, transform_indices = @transform_1, window_bounds = array<i64: 64, 64>}, {pipeline_mode = #tpu.pipeline_mode<synchronous>, transform_indices = @transform_2, window_bounds = array<i64: 1, 64>}, {pipeline_mode = #tpu.pipeline_mode<synchronous>, transform_indices = @transform_3, window_bounds = array<i64: 64, 2>}, {pipeline_mode = #tpu.pipeline_mode<synchronous>, transform_indices = @transform_4, window_bounds = array<i64: 1, 2>}, {transform_indices = @transform_5, window_bounds = array<i64: 8, 64>}, {transform_indices = @transform_6, window_bounds = array<i64: 8, 2>}]} {
    %c0 = arith.constant 0 : index
    %c0_0 = arith.constant 0 : index
    %0 = vector.load %arg1[%c0, %c0_0] : memref<8x64xf32, #tpu.memory_space<vmem>>, vector<8x64xf32>
    %c0_1 = arith.constant 0 : index
    %c0_2 = arith.constant 0 : index
    %1 = vector.load %arg2[%c0_1, %c0_2] : memref<64x64xf32, #tpu.memory_space<vmem>>, vector<64x64xf32>
    %cst = arith.constant dense<0.000000e+00> : vector<8x64xf32>
    %2 = tpu.matmul %0, %1, %cst {dimension_numbers = #tpu.dot_dimension_numbers<[1], [0], [0], [1], [0, 0, 1, 1], [], []>} : vector<8x64xf32>, vector<64x64xf32>, vector<8x64xf32> -> vector<8x64xf32>
    %c0_3 = arith.constant 0 : index
    %c0_4 = arith.constant 0 : index
    %3 = vector.load %arg3[%c0_3, %c0_4] : memref<1x64xf32, #tpu.memory_space<vmem>>, vector<1x64xf32>
    %4 = vector.broadcast %3 : vector<1x64xf32> to vector<8x64xf32>
    %5 = arith.addf %2, %4 : vector<8x64xf32>
    %cst_5 = arith.constant 0.000000e+00 : f32
    %6 = vector.broadcast %cst_5 : f32 to vector<8x64xf32>
    %7 = arith.maximumf %5, %6 : vector<8x64xf32>
    %c0_6 = arith.constant 0 : index
    %c0_7 = arith.constant 0 : index
    %8 = vector.load %arg6[%c0_6, %c0_7] : memref<8x64xf32, #tpu.memory_space<vmem>>, vector<8x64xf32>
    tpu.vector_store %arg6[%c0_6, %c0_7], %7 {strides = array<i32>} : memref<8x64xf32, #tpu.memory_space<vmem>>, vector<8x64xf32>,
    %c0_8 = arith.constant 0 : index
    %c0_9 = arith.constant 0 : index
    %9 = vector.load %arg4[%c0_8, %c0_9] : memref<64x2xf32, #tpu.memory_space<vmem>>, vector<64x2xf32>
    %cst_10 = arith.constant dense<0.000000e+00> : vector<8x2xf32>
    %10 = tpu.matmul %7, %9, %cst_10 {dimension_numbers = #tpu.dot_dimension_numbers<[1], [0], [0], [1], [0, 0, 1, 1], [], []>} : vector<8x64xf32>, vector<64x2xf32>, vector<8x2xf32> -> vector<8x2xf32>
    %c0_11 = arith.constant 0 : index
    %c0_12 = arith.constant 0 : index
    %11 = vector.load %arg5[%c0_11, %c0_12] : memref<1x2xf32, #tpu.memory_space<vmem>>, vector<1x2xf32>
    %12 = vector.broadcast %11 : vector<1x2xf32> to vector<8x2xf32>
    %13 = arith.addf %10, %12 : vector<8x2xf32>
    %14 = tpu.iota {dimensions = array<i32: 1>} : vector<8x2xi32>
    %cst_13 = arith.constant 0.000000e+00 : f32
    %15 = vector.broadcast %cst_13 : f32 to vector<8x2xf32>
    %16 = arith.maximumf %13, %15 : vector<8x2xf32>
    %17 = vector.broadcast %cst_13 : f32 to vector<8x2xf32>
    %18 = arith.subf %13, %17 : vector<8x2xf32>
    %19 = arith.cmpf one, %18, %18 : vector<8x2xf32>
    %20 = vector.broadcast %cst_13 : f32 to vector<8x2xf32>
    %21 = arith.addf %13, %20 : vector<8x2xf32>
    %22 = math.absf %18 : vector<8x2xf32>
    %cst_14 = arith.constant 0.000000e+00 : f32
    %23 = vector.broadcast %cst_14 : f32 to vector<8x2xf32>
    %24 = arith.subf %23, %22 : vector<8x2xf32>
    %25 = math.exp %24 : vector<8x2xf32>
    %26 = math.log1p %25 : vector<8x2xf32>
    %27 = arith.addf %16, %26 : vector<8x2xf32>
    %28 = arith.select %19, %21, %27 : vector<8x2xi1>, vector<8x2xf32>
    %cst_15 = arith.constant 1.000000e-03 : f32
    %29 = vector.broadcast %cst_15 : f32 to vector<8x2xf32>
    %30 = arith.addf %28, %29 : vector<8x2xf32>
    %c1_i32 = arith.constant 1 : i32
    %31 = vector.broadcast %c1_i32 : i32 to vector<8x2xi32>
    %32 = arith.cmpi eq, %14, %31 : vector<8x2xi32>
    %33 = arith.select %32, %30, %13 : vector<8x2xi1>, vector<8x2xf32>
    %c0_16 = arith.constant 0 : index
    %c0_17 = arith.constant 0 : index
    %34 = vector.load %arg7[%c0_16, %c0_17] : memref<8x2xf32, #tpu.memory_space<vmem>>, vector<8x2xf32>
    tpu.vector_store %arg7[%c0_16, %c0_17], %33 {strides = array<i32>} : memref<8x2xf32, #tpu.memory_space<vmem>>, vector<8x2xf32>,
    return
  }
  func.func @transform_0(%arg0: i32) -> (i32, i32) {
    %c0_i32 = arith.constant 0 : i32
    %c0_i32_0 = arith.constant 0 : i32
    return %arg0, %c0_i32 : i32, i32
  }
  func.func @transform_1(%arg0: i32) -> (i32, i32) {
    %c0_i32 = arith.constant 0 : i32
    %c0_i32_0 = arith.constant 0 : i32
    %c0_i32_1 = arith.constant 0 : i32
    return %c0_i32, %c0_i32_0 : i32, i32
  }
  func.func @transform_2(%arg0: i32) -> (i32, i32) {
    %c0_i32 = arith.constant 0 : i32
    %c0_i32_0 = arith.constant 0 : i32
    %c0_i32_1 = arith.constant 0 : i32
    return %c0_i32, %c0_i32_0 : i32, i32
  }
  func.func @transform_3(%arg0: i32) -> (i32, i32) {
    %c0_i32 = arith.constant 0 : i32
    %c0_i32_0 = arith.constant 0 : i32
    %c0_i32_1 = arith.constant 0 : i32
    return %c0_i32, %c0_i32_0 : i32, i32
  }
  func.func @transform_4(%arg0: i32) -> (i32, i32) {
    %c0_i32 = arith.constant 0 : i32
    %c0_i32_0 = arith.constant 0 : i32
    %c0_i32_1 = arith.constant 0 : i32
    return %c0_i32, %c0_i32_0 : i32, i32
  }
  func.func @transform_5(%arg0: i32) -> (i32, i32) {
    %c0_i32 = arith.constant 0 : i32
    %c0_i32_0 = arith.constant 0 : i32
    return %arg0, %c0_i32 : i32, i32
  }
  func.func @transform_6(%arg0: i32) -> (i32, i32) {
    %c0_i32 = arith.constant 0 : i32
    %c0_i32_0 = arith.constant 0 : i32
    return %arg0, %c0_i32 : i32, i32
  }
}

</mosaic_0001>

<bundles_post_ra>
// kernel: mlp_scale_forward.1
= control target key start
LH: loop header
LB: loop body
LE: loop exit
PB: predicated region body
PF: predicated region fallthrough
CT: control target
= control target key end

     0   :  { %12 = vsyncpa [#allocation3], 0  ;;  %s319_s0 = inlined_call_operand.hbm [shape: f32[8,64], index: 0, kind: input, shape index: {}]   ;;  %s320_s1 = inlined_call_operand.vmem [shape: f32[64,64], index: 1, kind: input, shape index: {}]   ;;  %s321_s2 = inlined_call_operand.vmem [shape: f32[1,64], index: 2, kind: input, shape index: {}]   ;;  %s322_s3 = inlined_call_operand.vmem [shape: f32[64,2], index: 3, kind: input, shape index: {}]   ;;  %s323_s4 = inlined_call_operand.vmem [shape: f32[1,2], index: 4, kind: input, shape index: {}]   ;;  %s324_s5 = inlined_call_operand.hbm [shape: f32[8,64], index: 5, kind: output, shape index: {0}]   ;;  %s325_s6 = inlined_call_operand.vmem [shape: f32[8,2], index: 6, kind: output, shape index: {1}]  }
   0x1   :  { %13 = vsyncpa [#allocation4], 0  ;;  %s19_s23 = sshll.u32 %s319_s0, 4  ;;  %s219_s24 = smov [#allocation2]   ;;  %s20_s23 = int_to_ptr.hbm [resolvable:$true] %s19_s23 }
   0x2   :  { %s21_s25 = sshll.u32 %s219_s24, 4  ;;  %s22_s25 = int_to_ptr.vmem [resolvable:$true] %s21_s25 }
   0x3   :  { %24 = dma.hbm_to_vmem [thread:$0]  %s20_s23, 128, %s22_s25, [#allocation3]  }
   0x4   :  { %215 = dma.done.wait [#allocation3], 128  }
   0x5   :  { %216 = vsyncadd [#allocation3], 4294967168  ;;  %v45_v0 = vld [vmem:[%s320_s1 + $0x38] sm:$0xff]  ;;  %v44_v1 = vld [vmem:[%s320_s1 + $0x30] sm:$0xff]  ;;  %vm50_vm0 = vcmask 523264   ;;  %s220_s9 = smov [#allocation5]   ;;  %v111_v31 = vlaneseq }
   0x6   :  { %62 = vmatpush.msra.mxu0 %v45_v0  ;;  %v43_v2 = vld [vmem:[%s320_s1 + $0x28] sm:$0xff]  ;;  %v83_v3 = vld [vmem:[%s322_s3 + $0x38] sm:$0xff]  ;;  %v82_v4 = vld [vmem:[%s322_s3 + $0x30] sm:$0xff]  ;;  %s141_s10 = sshll.u32 %s220_s9, 4  ;;  %s143_s13 = sshll.u32 %s324_s5, 4  ;;  %vm134_vm4 = vcmask 15360   ;;  %s142_s10 = int_to_ptr.vmem [resolvable:$true] %s141_s10  ;;  %s144_s13 = int_to_ptr.hbm [resolvable:$true] %s143_s13 }
   0x7   :  { %v42_v5 = vld [vmem:[%s320_s1 + $0x20] sm:$0xff]  ;;  %99 = vmatpush.msra.mxu1 %v83_v3  ;;  %v81_v6 = vld [vmem:[%s322_s3 + $0x28] sm:$0xff]  ;;  %v41_v7 = vld [vmem:[%s320_s1 + $0x18] sm:$0xff]  ;;  %v112_v36 = vand.u32 127, %v111_v31 }
   0x8   :  { %63 = vmatpush.msra.mxu0 %v44_v1  ;;  %v80_v8 = vld [vmem:[%s322_s3 + $0x20] sm:$0xff]  ;;  %v40_v9 = vld [vmem:[%s320_s1 + $0x10] sm:$0xff]  ;;  %v79_v10 = vld [vmem:[%s322_s3 + $0x18] sm:$0xff] }
   0x9   :  { %100 = vmatpush.msra.mxu1 %v82_v4  ;;  %v39_v11 = vld [vmem:[%s320_s1 + $0x8] sm:$0xff]  ;;  %v38_v12 = vld [vmem:[%s320_s1] sm:$0xff]  ;;  %v78_v14 = vld [vmem:[%s322_s3 + $0x10] sm:$0xff]  ;;  %vm132_vm3 = vcmp.eq.s32.totalorder %v112_v36, 1 }
   0xa   :  { %64 = vmatpush.msra.mxu0 %v43_v2  ;;  %v37_v13 = vld [vmem:[#allocation2] sm:$0xff]  ;;  %v77_v15 = vld [vmem:[%s322_s3 + $0x8] sm:$0xff] }
   0xb   :  { %101 = vmatpush.msra.mxu1 %v81_v6  ;;  %v76_v16 = vld [vmem:[%s322_s3] sm:$0xff] }
   0xc   :  { %65 = vmatpush.msra.mxu0 %v42_v5  ;;  %v161_v17 = vld [vmem:[%s321_s2] ss:$0 sm:$0xff] }
   0xd   :  { %102 = vmatpush.msra.mxu1 %v80_v8  ;;  %v162_v21 = vld [vmem:[%s323_s4] ss:$0 sm:$0xff] }
   0xe   :  { %66 = vmatpush.msra.mxu0 %v41_v7 }
   0xf   :  { %103 = vmatpush.msra.mxu1 %v79_v10 }
  0x10   :  { %67 = vmatpush.msra.mxu0 %v40_v9 }
  0x11   :  { %104 = vmatpush.msra.mxu1 %v78_v14 }
  0x12   :  { %68 = vmatpush.msra.mxu0 %v39_v11 }
  0x13   :  { %105 = vmatpush.msra.mxu1 %v77_v15 }
  0x14   :  { %69 = vmatpush.msra.mxu0 %v38_v12 }
  0x15   :  { %157 = vmatmul.msk.f32.vlgmr.msra.gmra.mxu0 %vm50_vm0, %v37_v13  ;;  %106 = vmatpush.msra.mxu1 %v76_v16 }
  0x92   :  { %v71_v18 = vpop.f32.mrf.mxu0 }
  0x93   :  { %v72_v19 = vadd.f32 %v161_v17, %v71_v18 }
  0x95   :  { %v74_v20 = vmax.f32 %v72_v19, 0.0 }
  0x97   :  { %75 = vst.msk [vmem:[#allocation5] sm:$0xff] %vm50_vm0, %v74_v20  ;;  %158 = vmatmul.msk.f32.vlgmr.msra.gmra.mxu1 %vm50_vm0, %v74_v20 }
  0x98   :  { %146 = dma.vmem_to_hbm [thread:$0]  %s142_s10, 128, %s144_s13, [#allocation4]  }
 0x114   :  { %v108_v22 = vpop.f32.mrf.mxu1 }
 0x115   :  { %v109_v23 = vadd.f32 %v162_v21, %v108_v22 }
 0x117   :  { %v116_v24 = vand.u32 2147483647, %v109_v23  ;;  %v113_v37 = vmax.f32 %v109_v23, 0.0  ;;  %vm114_vm2 = vcmp.ne.f32.partialorder %v109_v23, %v109_v23 }
 0x119   :  { %v117_v25 = vsub.f32 0.0, %v116_v24 }
 0x11b   :  { %v118_v26 = vmul.f32 1.442695, %v117_v25 }
 0x11d   :  { %163 = vpow2.f32 %v118_v26 }
 0x123   :  { %v164_v27 = vpop.eup %163 }
 0x124   :  { %v120_v28 = vadd.f32 1.0, %v164_v27  ;;  %v123_v29 = vmul.f32 -0.5, %v164_v27  ;;  %v126_v32 = vand.u32 2147483647, %v164_v27 }
 0x126   :  { %165 = vlog2.f32 %v120_v28  ;;  %v124_v30 = vadd.f32 1.0, %v123_v29  ;;  %vm127_vm1 = vcmp.lt.f32.partialorder %v126_v32, 0.0004427343 }
 0x128   :  { %v125_v35 = vmul.f32 %v164_v27, %v124_v30 }
 0x12c   :  { %v166_v33 = vpop.eup %165 }
 0x12d   :  { %v122_v34 = vmul.f32 0.6931472, %v166_v33 }
 0x12f   :  { %v128_v38 = vsel %vm127_vm1, %v125_v35, %v122_v34 }
 0x130   :  { %v129_v39 = vadd.f32 %v128_v38, %v113_v37 }
 0x132   :  { %v130_v40 = vsel %vm114_vm2, %v109_v23, %v129_v39 }
 0x133   :  { %v131_v41 = vadd.f32 0.001, %v130_v40 }
 0x135   :  { %v133_v42 = vsel %vm132_vm3, %v131_v41, %v109_v23 }
 0x136   :  { %135 = vst.msk [vmem:[%s325_s6] sm:$0xff] %vm134_vm4, %v133_v42 }
 0x137   :  { %217 = dma.done.wait [#allocation4], 128  }
 0x138   :  { %218 = vsyncadd [#allocation4], 4294967168 }
 0x139   :  { %155 = vsyncpa [#allocation3], 1 }
 0x13a   :  { %156 = vsyncpa [#allocation4], 1 }

</bundles_post_ra>
